<compile_context>
chip_gen: v5e
topology: v5e:2x2
jax: 0.10.0
libtpu: 0.0.40
codegen_flags: <defaults>
</compile_context>

<pallas_src>
import numpy as np
import jax
import jax.numpy as jnp
from jax.experimental import pallas as pl
from jax.experimental.pallas import tpu as pltpu

N_CH_IN = 256
H = W = 8
S = H * W                  # 64
POL_CH = 128
POL_IN = POL_CH * S        # 8192
POL_OUT = 8 * 8 * 64       # 4096
VAL_HID = 256
BN_EPS = 1e-5


def _full_spec(shape):
    nd = len(shape)
    return pl.BlockSpec(shape, lambda *_: (0,) * nd)


# ---------------------------------------------------------------------------
# Kernel 1: fused 1x1 convs (+folded BN) + ReLU for both heads, plus the whole
# value-head MLP (Linear 64->256, ReLU, Linear 256->1, Tanh).
# ---------------------------------------------------------------------------
def _heads_kernel(x_ref, wvc_ref, bvc_ref, w1_ref, b1_ref, w2_ref, b2_ref,
                  wpc_ref, bpc_ref, value_ref, hpol_ref):
    x = x_ref[...]                                   # (N, S, 256) f32
    n, s, c = x.shape
    x2d = x.reshape(n * s, c)                        # (N*S, 256): one MXU pass

    # ---- policy head: 1x1 conv (256 -> 128, BN folded) + ReLU, single matmul
    hp = jnp.dot(x2d, wpc_ref[...],
                 preferred_element_type=jnp.float32) + bpc_ref[...]   # (N*S, 128)
    hp = jnp.maximum(hp, 0.0)
    hpol_ref[...] = hp.reshape(n, s, POL_CH).astype(hpol_ref.dtype)   # bf16 out

    # ---- value head: 1x1 conv (out channels = 1, BN folded) as channel reduce
    # (negligible work; the whole block is dominated by the policy FC stream)
    hv = jnp.sum(x * wvc_ref[...], axis=-1) + bvc_ref[...]            # (N, S)
    hv = jnp.maximum(hv, 0.0)
    v1 = jnp.dot(hv, w1_ref[...], preferred_element_type=jnp.float32) + b1_ref[...]
    v1 = jnp.maximum(v1, 0.0)                                         # (N, 256)
    v = jnp.dot(v1, w2_ref[...], preferred_element_type=jnp.float32) + b2_ref[...]
    value_ref[...] = jnp.tanh(v)                                      # (N, 1)


def heads_forward(x_nsc, wvc, bvc, w1, b1, w2, b2, wpc, bpc):
    n = x_nsc.shape[0]
    args = (x_nsc, wvc, bvc, w1, b1, w2, b2, wpc, bpc)
    return pl.pallas_call(
        _heads_kernel,
        out_shape=(jax.ShapeDtypeStruct((n, 1), jnp.float32),
                   jax.ShapeDtypeStruct((n, S, POL_CH), jnp.bfloat16)),
        grid=(1,),
        in_specs=[_full_spec(a.shape) for a in args],
        out_specs=(_full_spec((n, 1)), _full_spec((n, S, POL_CH))),
    )(*args)


# ---------------------------------------------------------------------------
# Kernel 2: policy fully-connected layer, (N, 8192) @ (8192, 4096) + bias,
# bf16 weight streaming, f32 accumulation directly in the resident output
# block (no scratch).  Tiled over output columns (parallel) and contraction
# (arbitrary, innermost).
# ---------------------------------------------------------------------------
def _policy_fc_kernel(h_ref, w_ref, b_ref, o_ref):
    k = pl.program_id(1)

    @pl.when(k == 0)
    def _():
        o_ref[...] = jnp.broadcast_to(b_ref[...], o_ref.shape)

    o_ref[...] += jnp.dot(h_ref[...], w_ref[...],
                          preferred_element_type=jnp.float32)


def policy_fc(h, w, b, *, tn=1024, tk=2048):
    n, kdim = h.shape
    _, ndim = w.shape
    assert kdim % tk == 0 and ndim % tn == 0
    flops = 2 * n * kdim * ndim
    bytes_accessed = (w.size * w.dtype.itemsize + h.size * h.dtype.itemsize
                      + n * ndim * 4 + b.size * 4)
    return pl.pallas_call(
        _policy_fc_kernel,
        out_shape=jax.ShapeDtypeStruct((n, ndim), jnp.float32),
        grid_spec=pltpu.PrefetchScalarGridSpec(
            num_scalar_prefetch=0,
            grid=(ndim // tn, kdim // tk),
            in_specs=[pl.BlockSpec((n, tk), lambda j, k: (0, k)),
                      pl.BlockSpec((tk, tn), lambda j, k: (k, j)),
                      pl.BlockSpec((1, tn), lambda j, k: (0, j))],
            out_specs=pl.BlockSpec((n, tn), lambda j, k: (0, j))),
        compiler_params=pltpu.CompilerParams(
            dimension_semantics=("parallel", "arbitrary"),
            vmem_limit_bytes=32 * 1024 * 1024),
        cost_estimate=pl.CostEstimate(flops=flops, transcendentals=0,
                                      bytes_accessed=bytes_accessed),
    )(h, w, b)


# ---------------------------------------------------------------------------
# Parameter setup (deterministic) and ONE-TIME prep: BN folding, transposes,
# the policy-FC weight permutation and bf16 cast (all cached, not per-forward).
# ---------------------------------------------------------------------------
def init_params(key):
    ks = jax.random.split(key, 18)

    def nrm(k, shape, scale=1.0):
        return scale * jax.random.normal(k, shape, dtype=jnp.float32)

    return {
        # value head
        'vconv_w': nrm(ks[0], (1, N_CH_IN, 1, 1), 1.0 / 16.0),
        'vconv_b': nrm(ks[1], (1,), 0.05),
        'vbn_g':   1.0 + 0.1 * nrm(ks[2], (1,)),
        'vbn_b':   0.1 * nrm(ks[3], (1,)),
        'vbn_mean': 0.1 * nrm(ks[4], (1,)),
        'vbn_var': 0.8 + 0.2 * jax.random.uniform(ks[5], (1,), dtype=jnp.float32),
        'fc1_w': nrm(ks[6], (VAL_HID, S), 1.0 / 8.0),       # Linear(64, 256)
        'fc1_b': nrm(ks[7], (VAL_HID,), 0.05),
        'fc2_w': nrm(ks[8], (1, VAL_HID), 1.0 / 16.0),      # Linear(256, 1)
        'fc2_b': nrm(ks[9], (1,), 0.05),
        # policy head
        'pconv_w': nrm(ks[10], (POL_CH, N_CH_IN, 1, 1), 1.0 / 16.0),
        'pconv_b': nrm(ks[11], (POL_CH,), 0.05),
        'pbn_g':   1.0 + 0.1 * nrm(ks[12], (POL_CH,)),
        'pbn_b':   0.1 * nrm(ks[13], (POL_CH,)),
        'pbn_mean': 0.1 * nrm(ks[14], (POL_CH,)),
        'pbn_var': 0.8 + 0.2 * jax.random.uniform(ks[15], (POL_CH,), dtype=jnp.float32),
        'pfc_w': nrm(ks[16], (POL_OUT, POL_IN), 1.0 / 90.0),  # Linear(8192, 4096)
        'pfc_b': nrm(ks[17], (POL_OUT,), 0.05),
    }


def prepare_params(P):
    """One-time: fold BN (eval mode) into the 1x1 convs, transpose the small FC
    weights, and permute + bf16-cast the big policy FC weight."""
    vs = P['vbn_g'] / jnp.sqrt(P['vbn_var'] + BN_EPS)                     # (1,)
    wvc = (P['vconv_w'].reshape(1, N_CH_IN) * vs[:, None]).reshape(1, 1, N_CH_IN)
    bvc = ((P['vconv_b'] - P['vbn_mean']) * vs + P['vbn_b']).reshape(1, 1)

    ps = P['pbn_g'] / jnp.sqrt(P['pbn_var'] + BN_EPS)                     # (128,)
    wpc = (P['pconv_w'].reshape(POL_CH, N_CH_IN) * ps[:, None]).T         # (256, 128)
    bpc = ((P['pconv_b'] - P['pbn_mean']) * ps + P['pbn_b']).reshape(1, POL_CH)

    # Policy FC weight: PyTorch flatten order (c*64 + s) -> kernel order (s*128 + c).
    wp = jnp.transpose(P['pfc_w'].reshape(POL_OUT, POL_CH, S),
                       (2, 1, 0)).reshape(POL_IN, POL_OUT).astype(jnp.bfloat16)

    return {
        'wvc': wvc, 'bvc': bvc,
        'w1': P['fc1_w'].T, 'b1': P['fc1_b'].reshape(1, VAL_HID),
        'w2': P['fc2_w'].T, 'b2': P['fc2_b'].reshape(1, 1),
        'wpc': wpc, 'bpc': bpc,
        'pfc_w': wp, 'pfc_b': P['pfc_b'].reshape(1, POL_OUT),
    }


def outblock_forward(x_nchw, R):
    n = x_nchw.shape[0]
    # NCHW -> (N, S, C); tiny (128 KB) relayout
    x_nsc = jnp.transpose(x_nchw, (0, 2, 3, 1)).reshape(n, S, N_CH_IN)

    value, hpol = heads_forward(x_nsc, R['wvc'], R['bvc'], R['w1'], R['b1'],
                                R['w2'], R['b2'], R['wpc'], R['bpc'])
    hp = hpol.reshape(n, POL_IN)                # bf16, row-major -> index s*128 + c
    policy = policy_fc(hp, R['pfc_w'], R['pfc_b'])
    return value, policy


# ---------------------------------------------------------------------------
# Pure-JAX reference mirroring the PyTorch forward pass (eval-mode BN).
# ---------------------------------------------------------------------------
def reference_forward(x, P):
    n = x.shape[0]

    def bn(y, g, b, m, v):
        return ((y - m[None, :, None, None]) /
                jnp.sqrt(v[None, :, None, None] + BN_EPS) *
                g[None, :, None, None] + b[None, :, None, None])

    hv = jnp.einsum('nchw,oc->nohw', x, P['vconv_w'].reshape(1, N_CH_IN)) \
        + P['vconv_b'][None, :, None, None]
    hv = jnp.maximum(bn(hv, P['vbn_g'], P['vbn_b'], P['vbn_mean'], P['vbn_var']), 0.0)
    hv = hv.reshape(n, -1)                                     # (N, 64)
    v = jnp.maximum(hv @ P['fc1_w'].T + P['fc1_b'], 0.0)
    v = jnp.tanh(v @ P['fc2_w'].T + P['fc2_b'])                # (N, 1)

    hp = jnp.einsum('nchw,oc->nohw', x, P['pconv_w'].reshape(POL_CH, N_CH_IN)) \
        + P['pconv_b'][None, :, None, None]
    hp = jnp.maximum(bn(hp, P['pbn_g'], P['pbn_b'], P['pbn_mean'], P['pbn_var']), 0.0)
    hp = hp.reshape(n, -1)                                     # (N, 8192), c-major
    p = hp @ P['pfc_w'].T + P['pfc_b']                         # (N, 4096)
    return v, p


if __name__ == "__main__":
    key = jax.random.PRNGKey(0)
    pkey, xkey = jax.random.split(key)
    params = init_params(pkey)

    # One-time parameter prep (BN folding + big-weight permutation + bf16 cast).
    prepped = jax.block_until_ready(prepare_params(params))

    # Shape is pinned by the module itself: Conv2d(256, ...) and Linear(64, 256)
    # after Flatten of a 1-channel map => (N, 256, 8, 8).  Small batch N = 2.
    x = jax.random.normal(xkey, (2, N_CH_IN, H, W), dtype=jnp.float32)

    value, policy = jax.block_until_ready(outblock_forward(x, prepped))
    assert value.shape == (2, 1) and policy.shape == (2, POL_OUT)

    with jax.default_matmul_precision("highest"):
        v_ref, p_ref = jax.block_until_ready(reference_forward(x, params))

    np.testing.assert_allclose(np.asarray(value), np.asarray(v_ref), rtol=5e-2, atol=5e-2)
    np.testing.assert_allclose(np.asarray(policy), np.asarray(p_ref), rtol=5e-2, atol=5e-2)

    print("KERNEL_OK")
</pallas_src>

<mosaic_0001>
module attributes {stable_mosaic.version = 11 : i64} {
  func.func @_heads_kernel(%arg0: i32, %arg1: memref<2x64x256xf32, #tpu.memory_space<vmem>>, %arg2: memref<1x1x256xf32, #tpu.memory_space<vmem>>, %arg3: memref<1x1xf32, #tpu.memory_space<vmem>>, %arg4: memref<64x256xf32, #tpu.memory_space<vmem>>, %arg5: memref<1x256xf32, #tpu.memory_space<vmem>>, %arg6: memref<256x1xf32, #tpu.memory_space<vmem>>, %arg7: memref<1x1xf32, #tpu.memory_space<vmem>>, %arg8: memref<256x128xf32, #tpu.memory_space<vmem>>, %arg9: memref<1x128xf32, #tpu.memory_space<vmem>>, %arg10: memref<2x1xf32, #tpu.memory_space<vmem>>, %arg11: memref<2x64x128xbf16, #tpu.memory_space<vmem>>) attributes {dimension_semantics = [#tpu.dimension_semantics<arbitrary>], iteration_bounds = array<i64: 1>, scalar_prefetch = 0 : i64, scratch_operands = 0 : i64, tpu.core_type = #tpu.core_type<tc>, window_params = [{pipeline_mode = #tpu.pipeline_mode<synchronous>, transform_indices = @transform_0, window_bounds = array<i64: 2, 64, 256>}, {pipeline_mode = #tpu.pipeline_mode<synchronous>, transform_indices = @transform_1, window_bounds = array<i64: 1, 1, 256>}, {pipeline_mode = #tpu.pipeline_mode<synchronous>, transform_indices = @transform_2, window_bounds = array<i64: 1, 1>}, {pipeline_mode = #tpu.pipeline_mode<synchronous>, transform_indices = @transform_3, window_bounds = array<i64: 64, 256>}, {pipeline_mode = #tpu.pipeline_mode<synchronous>, transform_indices = @transform_4, window_bounds = array<i64: 1, 256>}, {pipeline_mode = #tpu.pipeline_mode<synchronous>, transform_indices = @transform_5, window_bounds = array<i64: 256, 1>}, {pipeline_mode = #tpu.pipeline_mode<synchronous>, transform_indices = @transform_6, window_bounds = array<i64: 1, 1>}, {pipeline_mode = #tpu.pipeline_mode<synchronous>, transform_indices = @transform_7, window_bounds = array<i64: 256, 128>}, {pipeline_mode = #tpu.pipeline_mode<synchronous>, transform_indices = @transform_8, window_bounds = array<i64: 1, 128>}, {pipeline_mode = #tpu.pipeline_mode<synchronous>, transform_indices = @transform_9, window_bounds = array<i64: 2, 1>}, {pipeline_mode = #tpu.pipeline_mode<synchronous>, transform_indices = @transform_10, window_bounds = array<i64: 2, 64, 128>}]} {
    %c0 = arith.constant 0 : index
    %c0_0 = arith.constant 0 : index
    %c0_1 = arith.constant 0 : index
    %0 = vector.load %arg1[%c0, %c0_0, %c0_1] : memref<2x64x256xf32, #tpu.memory_space<vmem>>, vector<2x64x256xf32>
    %1 = vector.shape_cast %0 : vector<2x64x256xf32> to vector<128x256xf32>
    %c0_2 = arith.constant 0 : index
    %c0_3 = arith.constant 0 : index
    %2 = vector.load %arg8[%c0_2, %c0_3] : memref<256x128xf32, #tpu.memory_space<vmem>>, vector<256x128xf32>
    %cst = arith.constant dense<0.000000e+00> : vector<128x128xf32>
    %3 = tpu.matmul %1, %2, %cst {dimension_numbers = #tpu.dot_dimension_numbers<[1], [0], [0], [1], [0, 0, 1, 1], [], []>} : vector<128x256xf32>, vector<256x128xf32>, vector<128x128xf32> -> vector<128x128xf32>
    %c0_4 = arith.constant 0 : index
    %c0_5 = arith.constant 0 : index
    %4 = vector.load %arg9[%c0_4, %c0_5] : memref<1x128xf32, #tpu.memory_space<vmem>>, vector<1x128xf32>
    %5 = vector.broadcast %4 : vector<1x128xf32> to vector<128x128xf32>
    %6 = arith.addf %3, %5 : vector<128x128xf32>
    %cst_6 = arith.constant 0.000000e+00 : f32
    %7 = vector.broadcast %cst_6 : f32 to vector<128x128xf32>
    %8 = arith.maximumf %6, %7 : vector<128x128xf32>
    %9 = vector.shape_cast %8 : vector<128x128xf32> to vector<2x64x128xf32>
    %10 = arith.truncf %9 : vector<2x64x128xf32> to vector<2x64x128xbf16>
    %c0_7 = arith.constant 0 : index
    %c0_8 = arith.constant 0 : index
    %c0_9 = arith.constant 0 : index
    %11 = vector.load %arg11[%c0_7, %c0_8, %c0_9] : memref<2x64x128xbf16, #tpu.memory_space<vmem>>, vector<2x64x128xbf16>
    tpu.vector_store %arg11[%c0_7, %c0_8, %c0_9], %10 {strides = array<i32>} : memref<2x64x128xbf16, #tpu.memory_space<vmem>>, vector<2x64x128xbf16>,
    %c0_10 = arith.constant 0 : index
    %c0_11 = arith.constant 0 : index
    %c0_12 = arith.constant 0 : index
    %12 = vector.load %arg2[%c0_10, %c0_11, %c0_12] : memref<1x1x256xf32, #tpu.memory_space<vmem>>, vector<1x1x256xf32>
    %13 = vector.broadcast %12 : vector<1x1x256xf32> to vector<2x64x256xf32>
    %14 = arith.mulf %0, %13 : vector<2x64x256xf32>
    %cst_13 = arith.constant dense<0.000000e+00> : vector<2x64xf32>
    %15 = vector.multi_reduction <add>, %14, %cst_13 [2] : vector<2x64x256xf32> to vector<2x64xf32>
    %c0_14 = arith.constant 0 : index
    %c0_15 = arith.constant 0 : index
    %16 = vector.load %arg3[%c0_14, %c0_15] : memref<1x1xf32, #tpu.memory_space<vmem>>, vector<1x1xf32>
    %17 = vector.broadcast %16 : vector<1x1xf32> to vector<2x64xf32>
    %18 = arith.addf %15, %17 : vector<2x64xf32>
    %cst_16 = arith.constant 0.000000e+00 : f32
    %19 = vector.broadcast %cst_16 : f32 to vector<2x64xf32>
    %20 = arith.maximumf %18, %19 : vector<2x64xf32>
    %c0_17 = arith.constant 0 : index
    %c0_18 = arith.constant 0 : index
    %21 = vector.load %arg4[%c0_17, %c0_18] : memref<64x256xf32, #tpu.memory_space<vmem>>, vector<64x256xf32>
    %cst_19 = arith.constant dense<0.000000e+00> : vector<2x256xf32>
    %22 = tpu.matmul %20, %21, %cst_19 {dimension_numbers = #tpu.dot_dimension_numbers<[1], [0], [0], [1], [0, 0, 1, 1], [], []>} : vector<2x64xf32>, vector<64x256xf32>, vector<2x256xf32> -> vector<2x256xf32>
    %c0_20 = arith.constant 0 : index
    %c0_21 = arith.constant 0 : index
    %23 = vector.load %arg5[%c0_20, %c0_21] : memref<1x256xf32, #tpu.memory_space<vmem>>, vector<1x256xf32>
    %24 = vector.broadcast %23 : vector<1x256xf32> to vector<2x256xf32>
    %25 = arith.addf %22, %24 : vector<2x256xf32>
    %cst_22 = arith.constant 0.000000e+00 : f32
    %26 = vector.broadcast %cst_22 : f32 to vector<2x256xf32>
    %27 = arith.maximumf %25, %26 : vector<2x256xf32>
    %c0_23 = arith.constant 0 : index
    %c0_24 = arith.constant 0 : index
    %28 = vector.load %arg6[%c0_23, %c0_24] : memref<256x1xf32, #tpu.memory_space<vmem>>, vector<256x1xf32>
    %cst_25 = arith.constant dense<0.000000e+00> : vector<2x1xf32>
    %29 = tpu.matmul %27, %28, %cst_25 {dimension_numbers = #tpu.dot_dimension_numbers<[1], [0], [0], [1], [0, 0, 1, 1], [], []>} : vector<2x256xf32>, vector<256x1xf32>, vector<2x1xf32> -> vector<2x1xf32>
    %c0_26 = arith.constant 0 : index
    %c0_27 = arith.constant 0 : index
    %30 = vector.load %arg7[%c0_26, %c0_27] : memref<1x1xf32, #tpu.memory_space<vmem>>, vector<1x1xf32>
    %31 = vector.broadcast %30 : vector<1x1xf32> to vector<2x1xf32>
    %32 = arith.addf %29, %31 : vector<2x1xf32>
    %33 = math.tanh %32 : vector<2x1xf32>
    %c0_28 = arith.constant 0 : index
    %c0_29 = arith.constant 0 : index
    %34 = vector.load %arg10[%c0_28, %c0_29] : memref<2x1xf32, #tpu.memory_space<vmem>>, vector<2x1xf32>
    tpu.vector_store %arg10[%c0_28, %c0_29], %33 {strides = array<i32>} : memref<2x1xf32, #tpu.memory_space<vmem>>, vector<2x1xf32>,
    return
  }
  func.func @transform_0(%arg0: i32) -> (i32, i32, i32) {
    %c0_i32 = arith.constant 0 : i32
    %c0_i32_0 = arith.constant 0 : i32
    %c0_i32_1 = arith.constant 0 : i32
    %c0_i32_2 = arith.constant 0 : i32
    return %c0_i32, %c0_i32_0, %c0_i32_1 : i32, i32, i32
  }
  func.func @transform_1(%arg0: i32) -> (i32, i32, i32) {
    %c0_i32 = arith.constant 0 : i32
    %c0_i32_0 = arith.constant 0 : i32
    %c0_i32_1 = arith.constant 0 : i32
    %c0_i32_2 = arith.constant 0 : i32
    return %c0_i32, %c0_i32_0, %c0_i32_1 : i32, i32, i32
  }
  func.func @transform_2(%arg0: i32) -> (i32, i32) {
    %c0_i32 = arith.constant 0 : i32
    %c0_i32_0 = arith.constant 0 : i32
    %c0_i32_1 = arith.constant 0 : i32
    return %c0_i32, %c0_i32_0 : i32, i32
  }
  func.func @transform_3(%arg0: i32) -> (i32, i32) {
    %c0_i32 = arith.constant 0 : i32
    %c0_i32_0 = arith.constant 0 : i32
    %c0_i32_1 = arith.constant 0 : i32
    return %c0_i32, %c0_i32_0 : i32, i32
  }
  func.func @transform_4(%arg0: i32) -> (i32, i32) {
    %c0_i32 = arith.constant 0 : i32
    %c0_i32_0 = arith.constant 0 : i32
    %c0_i32_1 = arith.constant 0 : i32
    return %c0_i32, %c0_i32_0 : i32, i32
  }
  func.func @transform_5(%arg0: i32) -> (i32, i32) {
    %c0_i32 = arith.constant 0 : i32
    %c0_i32_0 = arith.constant 0 : i32
    %c0_i32_1 = arith.constant 0 : i32
    return %c0_i32, %c0_i32_0 : i32, i32
  }
  func.func @transform_6(%arg0: i32) -> (i32, i32) {
    %c0_i32 = arith.constant 0 : i32
    %c0_i32_0 = arith.constant 0 : i32
    %c0_i32_1 = arith.constant 0 : i32
    return %c0_i32, %c0_i32_0 : i32, i32
  }
  func.func @transform_7(%arg0: i32) -> (i32, i32) {
    %c0_i32 = arith.constant 0 : i32
    %c0_i32_0 = arith.constant 0 : i32
    %c0_i32_1 = arith.constant 0 : i32
    return %c0_i32, %c0_i32_0 : i32, i32
  }
  func.func @transform_8(%arg0: i32) -> (i32, i32) {
    %c0_i32 = arith.constant 0 : i32
    %c0_i32_0 = arith.constant 0 : i32
    %c0_i32_1 = arith.constant 0 : i32
    return %c0_i32, %c0_i32_0 : i32, i32
  }
  func.func @transform_9(%arg0: i32) -> (i32, i32) {
    %c0_i32 = arith.constant 0 : i32
    %c0_i32_0 = arith.constant 0 : i32
    %c0_i32_1 = arith.constant 0 : i32
    return %c0_i32, %c0_i32_0 : i32, i32
  }
  func.func @transform_10(%arg0: i32) -> (i32, i32, i32) {
    %c0_i32 = arith.constant 0 : i32
    %c0_i32_0 = arith.constant 0 : i32
    %c0_i32_1 = arith.constant 0 : i32
    %c0_i32_2 = arith.constant 0 : i32
    return %c0_i32, %c0_i32_0, %c0_i32_1 : i32, i32, i32
  }
}

</mosaic_0001>

<bundles_post_ra>
// kernel: tpu_custom_call.1
= control target key start
LH: loop header
LB: loop body
LE: loop exit
PB: predicated region body
PF: predicated region fallthrough
CT: control target
= control target key end

     0   :  { %s1373_s0 = inlined_call_operand.vmem [shape: f32[2,64,256], index: 0, kind: input, shape index: {}]   ;;  %s1374_s1 = inlined_call_operand.vmem [shape: f32[1,1,256], index: 1, kind: input, shape index: {}]   ;;  %s1375_s2 = inlined_call_operand.<no memory space> [shape: f32[1,1], index: 2, kind: input, shape index: {}]   ;;  %s1376_s3 = inlined_call_operand.hbm [shape: f32[64,256], index: 3, kind: input, shape index: {}]   ;;  %s1377_s4 = inlined_call_operand.vmem [shape: f32[1,256], index: 4, kind: input, shape index: {}]   ;;  %s1378_s5 = inlined_call_operand.vmem [shape: f32[256,1], index: 5, kind: input, shape index: {}]   ;;  %s1379_s7 = inlined_call_operand.hbm [shape: f32[256,128], index: 7, kind: input, shape index: {}]   ;;  %s1380_s8 = inlined_call_operand.vmem [shape: f32[1,128], index: 8, kind: input, shape index: {}]   ;;  %s1381_s9 = inlined_call_operand.vmem [shape: f32[2,1], index: 9, kind: output, shape index: {0}]   ;;  %s1382_s10 = inlined_call_operand.hbm [shape: bf16[2,64,128], index: 10, kind: output, shape index: {1}]   ;;  %s1383_s6 = inlined_call_operand.<no memory space> [shape: f32[1,1], index: 6, kind: input, shape index: {}]  }
   0x1   :  { %v16_v0 = vstv %s1375_s2  ;;  %v18_v1 = vstv %s1383_s6 }
   0x2   :  { %17 = vst [vmem:[#allocation2] sm:$0x1] %v16_v0 }
   0x3   :  { %19 = vst [vmem:[#allocation3] sm:$0x1] %v18_v1 }
   0x4   :  { %20 = vsyncpa [#allocation5], 0 }
   0x5   :  { %21 = vsyncpa [#allocation8], 0 }
   0x6   :  { %22 = vsyncpa [#allocation6], 0  ;;  %s33_s19 = sshll.u32 %s1376_s3, 4  ;;  %s851_s20 = smov [#allocation4]   ;;  %s34_s19 = int_to_ptr.hbm [resolvable:$true] %s33_s19 }
   0x7   :  { %s35_s21 = sshll.u32 %s851_s20, 4  ;;  %s52_s2 = sshll.u32 %s1379_s7, 4  ;;  %s36_s21 = int_to_ptr.vmem [resolvable:$true] %s35_s21  ;;  %s53_s2 = int_to_ptr.hbm [resolvable:$true] %s52_s2 }
   0x8   :  { %s852_s24 = smov 256   ;;  %s853_s25 = smov 16  }
   0x9   :  { %41 = dma.hbm_to_vmem [thread:$0]  %s34_s19, 2048, %s36_s21, [#allocation5], %s852_s24, %s852_s24, %s853_s25  }
   0xa   :  { %s854_s6 = smov [#allocation7]   ;;  %s855_s27 = smov 128  }
   0xb   :  { %s54_s26 = sshll.u32 %s854_s6, 4  ;;  %s856_s28 = smov 8   ;;  %s55_s26 = int_to_ptr.vmem [resolvable:$true] %s54_s26 }
   0xc   :  { %60 = dma.hbm_to_vmem [thread:$0]  %s53_s2, 4096, %s55_s26, [#allocation8], %s855_s27, %s855_s27, %s856_s28  }
   0xd   :  { %845 = dma.done.wait [#allocation5], 2048  }
   0xe   :  { %846 = vsyncadd [#allocation5], 4294965248 }
   0xf   :  { %847 = dma.done.wait [#allocation8], 4096  }
  0x10   :  { %848 = vsyncadd [#allocation8], 4294963200  ;;  %v931_v2 = vld [vmem:[%s1373_s0 + $0x80] sm:$0xff]  ;;  %v936_v3 = vld [vmem:[%s1373_s0 + $0x88] sm:$0xff]  ;;  %v857_v5 = vmov 0   ;;  %vm485_vm0 = vcmask 130112  }
  0x11   :  { %v317_v4 = vld [vmem:[%s1374_s1] sm:$0x3]  ;;  %767 = vset.pattern.permute.xlu0 %v857_v5  ;;  %v953_v9 = vld [vmem:[%s1373_s0 + $0x28] sm:$0xff]  ;;  %v976_v16 = vld [vmem:[%s1373_s0 + $0x90] sm:$0xff]  ;;  %vm489_vm1 = vcmask 195712   ;;  %vm493_vm2 = vcmask 261312  }
  0x12   :  { %v941_v6 = vperm.slane %v317_v4, 0  ;;  %v943_v7 = vperm.slane %v317_v4, 1  ;;  %v948_v8 = vld [vmem:[%s1373_s0 + $0x20] sm:$0xff]  ;;  %v963_v11 = vld [vmem:[%s1373_s0 + $0x8] sm:$0xff]  ;;  %v985_v19 = vld [vmem:[%s1373_s0 + $0x98] sm:$0xff]  ;;  %vm497_vm3 = vcmask 326912  }
  0x13   :  { %v958_v10 = vld [vmem:[%s1373_s0] sm:$0xff]  ;;  %v995_v21 = vld [vmem:[%s1373_s0 + $0xa8] sm:$0xff]  ;;  %v1000_v24 = vld [vmem:[%s1373_s0 + $0x10] sm:$0xff]  ;;  %vm501_vm4 = vcmask 392512   ;;  %vm505_vm5 = vcmask 458112   ;;  %vm509_vm6 = vcmask 523712  }
  0x14   :  { %v339_v12 = vmul.f32 %v941_v6, %v931_v2  ;;  %v340_v13 = vmul.f32 %v943_v7, %v936_v3  ;;  %v327_v14 = vmul.f32 %v941_v6, %v948_v8  ;;  %v328_v15 = vmul.f32 %v943_v7, %v953_v9  ;;  %v990_v20 = vld [vmem:[%s1373_s0 + $0xa0] sm:$0xff]  ;;  %v1005_v25 = vld [vmem:[%s1373_s0 + $0x18] sm:$0xff]  ;;  %v132_v33 = vld [vmem:[#allocation7 + $0xe8] sm:$0xff]  ;;  %s660_s13 = sshll.u32 %s1382_s10, 4  ;;  %s859_s14 = smov 64   ;;  %s661_s13 = int_to_ptr.hbm [resolvable:$true] %s660_s13 }
  0x15   :  { %v323_v17 = vmul.f32 %v941_v6, %v958_v10  ;;  %v324_v18 = vmul.f32 %v943_v7, %v963_v11  ;;  %v134_v26 = vld [vmem:[#allocation7 + $0xf8] sm:$0xff]  ;;  %v341_v28 = vmul.f32 %v941_v6, %v976_v16  ;;  %v133_v29 = vld [vmem:[#allocation7 + $0xf0] sm:$0xff]  ;;  %v342_v30 = vmul.f32 %v943_v7, %v985_v19  ;;  %v131_v36 = vld [vmem:[#allocation7 + $0xe0] sm:$0xff]  ;;  %s860_s15 = smov 4  }
  0x16   :  { %v379_v22 = vadd.f32 %v340_v13, %v339_v12  ;;  %v361_v23 = vadd.f32 %v328_v15, %v327_v14  ;;  %204 = vmatpush.msra.mxu1 %v134_v26  ;;  %v343_v31 = vmul.f32 %v941_v6, %v990_v20  ;;  %v344_v32 = vmul.f32 %v943_v7, %v995_v21  ;;  %v1022_v39 = vld [vmem:[%s1373_s0 + $0x30] sm:$0xff]  ;;  %v130_v40 = vld [vmem:[#allocation7 + $0xd8] sm:$0xff]  ;;  %v127_v51 = vld [vmem:[#allocation7 + $0xc0] sm:$0xff] }
  0x17   :  { %v355_v27 = vadd.f32 %v324_v18, %v323_v17  ;;  %v325_v34 = vmul.f32 %v941_v6, %v1000_v24  ;;  %v326_v35 = vmul.f32 %v943_v7, %v1005_v25  ;;  %741 = vmatpush.msra.mxu3 %v134_v26  ;;  %v382_v37 = vadd.f32 %v342_v30, %v341_v28  ;;  %v1027_v42 = vld [vmem:[%s1373_s0 + $0x38] sm:$0xff]  ;;  %v1032_v43 = vld [vmem:[%s1373_s0 + $0xb0] sm:$0xff]  ;;  %v1050_v54 = vld [vmem:[%s1373_s0 + $0x40] sm:$0xff] }
  0x18   :  { %380 = vadd.xlane.f32.xlu1 %v379_v22  ;;  %362 = vadd.xlane.f32.xlu2 %v361_v23  ;;  %v385_v38 = vadd.f32 %v344_v32, %v343_v31  ;;  %v1037_v44 = vld [vmem:[%s1373_s0 + $0xb8] sm:$0xff]  ;;  %v329_v46 = vmul.f32 %v941_v6, %v1022_v39  ;;  %v330_v47 = vmul.f32 %v943_v7, %v1027_v42  ;;  %v128_v50 = vld [vmem:[#allocation7 + $0xc8] sm:$0xff]  ;;  %v1060_v57 = vld [vmem:[%s1373_s0 + $0xc0] sm:$0xff]  ;;  %vm526_vm7 = vcmask 1041409  }
  0x19   :  { %356 = vadd.xlane.f32.xlu0 %v355_v27  ;;  %205 = vmatpush.msra.mxu1 %v133_v29  ;;  %v358_v41 = vadd.f32 %v326_v35, %v325_v34  ;;  %v129_v45 = vld [vmem:[#allocation7 + $0xd0] sm:$0xff]  ;;  %v345_v48 = vmul.f32 %v941_v6, %v1032_v43  ;;  %v346_v49 = vmul.f32 %v943_v7, %v1037_v44  ;;  %v126_v55 = vld [vmem:[#allocation7 + $0xb8] sm:$0xff]  ;;  %v1055_v56 = vld [vmem:[%s1373_s0 + $0x48] sm:$0xff]  ;;  %vm528_vm8 = vcmask 523264  }
  0x1a   :  { %742 = vmatpush.msra.mxu3 %v133_v29  ;;  %v364_v52 = vadd.f32 %v330_v47, %v329_v46  ;;  %v1065_v58 = vld [vmem:[%s1373_s0 + $0xc8] sm:$0xff]  ;;  %v125_v59 = vld [vmem:[#allocation7 + $0xb0] sm:$0xff]  ;;  %v331_v60 = vmul.f32 %v941_v6, %v1050_v54  ;;  %v332_v61 = vmul.f32 %v943_v7, %v1055_v56  ;;  %v347_v62 = vmul.f32 %v941_v6, %v1060_v57  ;;  %v122_v13 = vld [vmem:[#allocation7 + $0x98] sm:$0xff] }
  0x1b   :  { %206 = vmatpush.msra.mxu1 %v132_v33  ;;  %v388_v53 = vadd.f32 %v346_v49, %v345_v48  ;;  %v348_v63 = vmul.f32 %v943_v7, %v1065_v58  ;;  %v124_v0 = vld [vmem:[#allocation7 + $0xa8] sm:$0xff]  ;;  %v123_v1 = vld [vmem:[#allocation7 + $0xa0] sm:$0xff]  ;;  %v1083_v14 = vld [vmem:[%s1373_s0 + $0x58] sm:$0xff]  ;;  %vm650_vm9 = vcmask 1024  }
  0x1c   :  { %743 = vmatpush.msra.mxu3 %v132_v33  ;;  %v367_v4 = vadd.f32 %v332_v61, %v331_v60  ;;  %v1078_v12 = vld [vmem:[%s1373_s0 + $0x50] sm:$0xff]  ;;  %v1093_v17 = vld [vmem:[%s1373_s0 + $0xd8] sm:$0xff]  ;;  %v334_v23 = vmul.f32 %v943_v7, %v1083_v14  ;;  %v768_v29 = vld [vmem:[#allocation2] ss:$0 sm:$0xff] }
  0x1d   :  { %207 = vmatpush.msra.mxu1 %v131_v36  ;;  %v391_v5 = vadd.f32 %v348_v63, %v347_v62  ;;  %v1088_v15 = vld [vmem:[%s1373_s0 + $0xd0] sm:$0xff]  ;;  %v333_v22 = vmul.f32 %v941_v6, %v1078_v12  ;;  %v350_v27 = vmul.f32 %v943_v7, %v1093_v17  ;;  %v119_v30 = vld [vmem:[#allocation7 + $0x80] sm:$0xff] }
  0x1e   :  { %744 = vmatpush.msra.mxu3 %v131_v36  ;;  %v121_v18 = vld [vmem:[#allocation7 + $0x90] sm:$0xff]  ;;  %v349_v26 = vmul.f32 %v941_v6, %v1088_v15  ;;  %v120_v28 = vld [vmem:[#allocation7 + $0x88] sm:$0xff]  ;;  %v1106_v33 = vld [vmem:[%s1373_s0 + $0x60] sm:$0xff] }
  0x1f   :  { %208 = vmatpush.msra.mxu1 %v130_v40  ;;  %v370_v31 = vadd.f32 %v334_v23, %v333_v22  ;;  %v1111_v34 = vld [vmem:[%s1373_s0 + $0x68] sm:$0xff]  ;;  %v1116_v35 = vld [vmem:[%s1373_s0 + $0xe0] sm:$0xff]  ;;  %v444_v22 = vld [vmem:[#allocation4 + $0x10] sm:$0xff] }
  0x20   :  { %383 = vadd.xlane.f32.xlu1 %v382_v37  ;;  %386 = vadd.xlane.f32.xlu2 %v385_v38  ;;  %v394_v32 = vadd.f32 %v350_v27, %v349_v26  ;;  %v1121_v36 = vld [vmem:[%s1373_s0 + $0xe8] sm:$0xff]  ;;  %v118_v37 = vld [vmem:[#allocation7 + $0x78] sm:$0xff]  ;;  %v117_v38 = vld [vmem:[#allocation7 + $0x70] sm:$0xff] }
  0x21   :  { %359 = vadd.xlane.f32.xlu0 %v358_v41  ;;  %209 = vmatpush.msra.mxu1 %v129_v45  ;;  %v336_v41 = vmul.f32 %v943_v7, %v1111_v34  ;;  %v352_v46 = vmul.f32 %v943_v7, %v1121_v36  ;;  %v115_v47 = vld [vmem:[#allocation7 + $0x60] sm:$0xff] }
  0x22   :  { %745 = vmatpush.msra.mxu3 %v130_v40  ;;  %v335_v40 = vmul.f32 %v941_v6, %v1106_v33  ;;  %725 = vmatpush.msra.mxu2 %v118_v37 }
  0x23   :  { %210 = vmatpush.msra.mxu1 %v128_v50  ;;  %139 = vmatpush.msra.mxu0 %v118_v37 }
  0x24   :  { %746 = vmatpush.msra.mxu3 %v129_v45  ;;  %v351_v45 = vmul.f32 %v941_v6, %v1116_v35  ;;  %726 = vmatpush.msra.mxu2 %v117_v38  ;;  %v373_v48 = vadd.f32 %v336_v41, %v335_v40 }
  0x25   :  { %211 = vmatpush.msra.mxu1 %v127_v51  ;;  %140 = vmatpush.msra.mxu0 %v117_v38 }
  0x26   :  { %747 = vmatpush.msra.mxu3 %v128_v50  ;;  %v397_v49 = vadd.f32 %v352_v46, %v351_v45  ;;  %v1135_v50 = vld [vmem:[%s1373_s0 + $0x70] sm:$0xff] }
  0x27   :  { %212 = vmatpush.msra.mxu1 %v126_v55  ;;  %v337_v60 = vmul.f32 %v941_v6, %v1135_v50 }
  0x28   :  { %365 = vadd.xlane.f32.xlu1 %v364_v52  ;;  %389 = vadd.xlane.f32.xlu2 %v388_v53  ;;  %v1145_v52 = vld [vmem:[%s1373_s0 + $0xf0] sm:$0xff]  ;;  %v102_v53 = vld [vmem:[%s1373_s0 + $0xf8] sm:$0xff] }
  0x29   :  { %213 = vmatpush.msra.mxu1 %v125_v59  ;;  %748 = vmatpush.msra.mxu3 %v127_v51  ;;  %v1140_v51 = vld [vmem:[%s1373_s0 + $0x78] sm:$0xff]  ;;  %v353_v62 = vmul.f32 %v941_v6, %v1145_v52  ;;  %v354_v63 = vmul.f32 %v943_v7, %v102_v53  ;;  %v108_v6 = vld [vmem:[#allocation7 + $0x28] sm:$0xff] }
  0x2a   :  { %v338_v61 = vmul.f32 %v943_v7, %v1140_v51  ;;  %v107_v7 = vld [vmem:[#allocation7 + $0x20] sm:$0xff] }
  0x2b   :  { %214 = vmatpush.msra.mxu1 %v124_v0  ;;  %749 = vmatpush.msra.mxu3 %v126_v55  ;;  %v114_v55 = vld [vmem:[#allocation7 + $0x58] sm:$0xff] }
  0x2d   :  { %215 = vmatpush.msra.mxu1 %v123_v1  ;;  %750 = vmatpush.msra.mxu3 %v125_v59  ;;  %v113_v59 = vld [vmem:[#allocation7 + $0x50] sm:$0xff] }
  0x2f   :  { %216 = vmatpush.msra.mxu1 %v122_v13  ;;  %751 = vmatpush.msra.mxu3 %v124_v0  ;;  %v111_v0 = vld [vmem:[#allocation7 + $0x40] sm:$0xff] }
  0x30   :  { %368 = vadd.xlane.f32.xlu1 %v367_v4  ;;  %392 = vadd.xlane.f32.xlu2 %v391_v5  ;;  %v110_v4 = vld [vmem:[#allocation7 + $0x38] sm:$0xff]  ;;  %v109_v5 = vld [vmem:[#allocation7 + $0x30] sm:$0xff] }
  0x31   :  { %217 = vmatpush.msra.mxu1 %v121_v18  ;;  %752 = vmatpush.msra.mxu3 %v123_v1  ;;  %v400_v1 = vadd.f32 %v354_v63, %v353_v62 }
  0x33   :  { %218 = vmatpush.msra.mxu1 %v120_v28  ;;  %753 = vmatpush.msra.mxu3 %v122_v13  ;;  %v106_v13 = vld [vmem:[#allocation7 + $0x18] sm:$0xff] }
  0x35   :  { %407 = vperm.xlu0 %767, %v768_v29   ;;  %219 = vmatpush.msra.mxu1 %v119_v30  ;;  %v442_v29 = vld [vmem:[#allocation4] sm:$0xff] }
  0x36   :  { %220 = vmatmul.f32.vlgmr.msra.gmra.mxu1 %v963_v11  ;;  %v116_v11 = vld [vmem:[#allocation7 + $0x68] sm:$0xff]  ;;  %754 = vmatpush.msra.mxu3 %v121_v18  ;;  %v103_v18 = vld [vmem:[#allocation7] sm:$0xff] }
  0x37   :  { %727 = vmatpush.msra.mxu2 %v116_v11  ;;  %141 = vmatpush.msra.mxu0 %v116_v11 }
  0x38   :  { %371 = vadd.xlane.f32.xlu1 %v370_v31  ;;  %395 = vadd.xlane.f32.xlu2 %v394_v32 }
  0x39   :  { %755 = vmatpush.msra.mxu3 %v120_v28  ;;  %728 = vmatpush.msra.mxu2 %v115_v47  ;;  %v445_v28 = vld [vmem:[#allocation4 + $0x18] sm:$0xff] }
  0x3a   :  { %142 = vmatpush.msra.mxu0 %v115_v47 }
  0x3b   :  { %756 = vmatpush.msra.mxu3 %v119_v30  ;;  %729 = vmatpush.msra.mxu2 %v114_v55  ;;  %v443_v30 = vld [vmem:[#allocation4 + $0x8] sm:$0xff] }
  0x3c   :  { %253 = vmatmul.f32.vlgmr.msra.gmra.mxu3 %v1037_v44  ;;  %143 = vmatpush.msra.mxu0 %v114_v55  ;;  %v376_v44 = vadd.f32 %v338_v61, %v337_v60 }
  0x3d   :  { %730 = vmatpush.msra.mxu2 %v113_v59 }
  0x3e   :  { %223 = vmatmul.f32.gmra.mxu1 %v1005_v25  ;;  %v112_v25 = vld [vmem:[#allocation7 + $0x48] sm:$0xff]  ;;  %144 = vmatpush.msra.mxu0 %v113_v59 }
  0x3f   :  { %731 = vmatpush.msra.mxu2 %v112_v25 }
  0x40   :  { %374 = vadd.xlane.f32.xlu1 %v373_v48  ;;  %398 = vadd.xlane.f32.xlu2 %v397_v49 }
  0x41   :  { %732 = vmatpush.msra.mxu2 %v111_v0  ;;  %145 = vmatpush.msra.mxu0 %v112_v25 }
  0x43   :  { %733 = vmatpush.msra.mxu2 %v110_v4  ;;  %146 = vmatpush.msra.mxu0 %v111_v0 }
  0x44   :  { %256 = vmatmul.f32.gmra.mxu3 %v1065_v58  ;;  %v104_v58 = vld [vmem:[#allocation7 + $0x8] sm:$0xff] }
  0x45   :  { %734 = vmatpush.msra.mxu2 %v109_v5  ;;  %147 = vmatpush.msra.mxu0 %v110_v4 }
  0x46   :  { %226 = vmatmul.f32.gmra.mxu1 %v953_v9  ;;  %v105_v9 = vld [vmem:[#allocation7 + $0x10] sm:$0xff] }
  0x47   :  { %735 = vmatpush.msra.mxu2 %v108_v6  ;;  %148 = vmatpush.msra.mxu0 %v109_v5 }
  0x48   :  { %377 = vadd.xlane.f32.xlu1 %v376_v44  ;;  %401 = vadd.xlane.f32.xlu2 %v400_v1 }
  0x49   :  { %736 = vmatpush.msra.mxu2 %v107_v7  ;;  %149 = vmatpush.msra.mxu0 %v108_v6 }
  0x4b   :  { %737 = vmatpush.msra.mxu2 %v106_v13  ;;  %150 = vmatpush.msra.mxu0 %v107_v7 }
  0x4c   :  { %259 = vmatmul.f32.gmra.mxu3 %v1093_v17  ;;  %v446_v17 = vld [vmem:[#allocation4 + $0x20] sm:$0xff] }
  0x4d   :  { %738 = vmatpush.msra.mxu2 %v105_v9  ;;  %151 = vmatpush.msra.mxu0 %v106_v13 }
  0x4e   :  { %229 = vmatmul.f32.gmra.mxu1 %v1027_v42  ;;  %v452_v42 = vld [vmem:[#allocation4 + $0x50] sm:$0xff] }
  0x4f   :  { %739 = vmatpush.msra.mxu2 %v104_v58  ;;  %152 = vmatpush.msra.mxu0 %v105_v9 }
  0x51   :  { %740 = vmatpush.msra.mxu2 %v103_v18  ;;  %153 = vmatpush.msra.mxu0 %v104_v58 }
  0x52   :  { %185 = vmatmul.f32.vlgmr.msra.gmra.mxu2 %v990_v20  ;;  %v454_v20 = vld [vmem:[#allocation4 + $0x60] sm:$0xff] }
  0x53   :  { %154 = vmatpush.msra.mxu0 %v103_v18 }
  0x54   :  { %262 = vmatmul.f32.gmra.mxu3 %v1121_v36  ;;  %155 = vmatmul.f32.vlgmr.msra.gmra.mxu0 %v958_v10  ;;  %v456_v10 = vld [vmem:[#allocation4 + $0x70] sm:$0xff] }
  0x55   :  { %539 = vmatpush.msrb.mxu2 %v456_v10 }
  0x56   :  { %232 = vmatmul.f32.gmra.mxu1 %v1055_v56 }
  0x57   :  { %540 = vmatpush.msrb.mxu2 %v454_v20 }
  0x59   :  { %541 = vmatpush.msrb.mxu2 %v452_v42 }
  0x5a   :  { %188 = vmatmul.f32.gmra.mxu2 %v1032_v43  ;;  %v455_v43 = vld [vmem:[#allocation4 + $0x68] sm:$0xff] }
  0x5c   :  { %265 = vmatmul.f32.gmra.mxu3 %v102_v53  ;;  %158 = vmatmul.f32.gmra.mxu0 %v1000_v24  ;;  %v457_v24 = vld [vmem:[#allocation4 + $0x78] sm:$0xff] }
  0x5d   :  { %559 = vmatpush.msrb.mxu3 %v457_v24 }
  0x5e   :  { %235 = vmatmul.f32.gmra.mxu1 %v1083_v14  ;;  %v448_v14 = vld [vmem:[#allocation4 + $0x30] sm:$0xff] }
  0x5f   :  { %560 = vmatpush.msrb.mxu3 %v455_v43 }
  0x62   :  { %191 = vmatmul.f32.gmra.mxu2 %v1060_v57 }
  0x64   :  { %161 = vmatmul.f32.gmra.mxu0 %v948_v8  ;;  %v450_v8 = vld [vmem:[#allocation4 + $0x40] sm:$0xff] }
  0x65   :  { %542 = vmatpush.msrb.mxu2 %v450_v8 }
  0x66   :  { %238 = vmatmul.f32.gmra.mxu1 %v1111_v34 }
  0x67   :  { %543 = vmatpush.msrb.mxu2 %v448_v14 }
  0x69   :  { %544 = vmatpush.msrb.mxu2 %v446_v17 }
  0x6a   :  { %194 = vmatmul.f32.gmra.mxu2 %v1088_v15  ;;  %v451_v15 = vld [vmem:[#allocation4 + $0x48] sm:$0xff] }
  0x6b   :  { %545 = vmatpush.msrb.mxu2 %v444_v22 }
  0x6c   :  { %164 = vmatmul.f32.gmra.mxu0 %v1022_v39 }
  0x6d   :  { %546 = vmatpush.msrb.mxu2 %v442_v29 }
  0x6e   :  { %241 = vmatmul.f32.gmra.mxu1 %v1140_v51 }
  0x72   :  { %197 = vmatmul.f32.gmra.mxu2 %v1116_v35 }
  0x74   :  { %167 = vmatmul.f32.gmra.mxu0 %v1050_v54 }
  0x76   :  { %244 = vmatmul.f32.gmra.mxu1 %v936_v3  ;;  %v453_v3 = vld [vmem:[#allocation4 + $0x58] sm:$0xff] }
  0x77   :  { %561 = vmatpush.msrb.mxu3 %v453_v3 }
  0x79   :  { %562 = vmatpush.msrb.mxu3 %v451_v15 }
  0x7a   :  { %200 = vmatmul.f32.gmra.mxu2 %v1145_v52 }
  0x7c   :  { %170 = vmatmul.f32.gmra.mxu0 %v1078_v12  ;;  %v449_v12 = vld [vmem:[#allocation4 + $0x38] sm:$0xff] }
  0x7d   :  { %563 = vmatpush.msrb.mxu3 %v449_v12 }
  0x7e   :  { %247 = vmatmul.f32.gmra.mxu1 %v985_v19 }
  0x84   :  { %173 = vmatmul.f32.gmra.mxu0 %v1106_v33 }
  0x86   :  { %250 = vmatmul.f32.gmra.mxu1 %v995_v21  ;;  %v447_v21 = vld [vmem:[#allocation4 + $0x28] sm:$0xff] }
  0x87   :  { %564 = vmatpush.msrb.mxu3 %v447_v21 }
  0x89   :  { %565 = vmatpush.msrb.mxu3 %v445_v28 }
  0x8b   :  { %v381_v39 = vpop.xlane.xlu1 %380  ;;  %v363_v54 = vpop.xlane.xlu2 %362  ;;  %566 = vmatpush.msrb.mxu3 %v443_v30 }
  0x8c   :  { %176 = vmatmul.f32.gmra.mxu0 %v1135_v50  ;;  %v357_v56 = vpop.xlane.xlu0 %356 }
  0x93   :  { %v384_v57 = vpop.xlane.xlu1 %383  ;;  %v387_v19 = vpop.xlane.xlu2 %386 }
  0x94   :  { %179 = vmatmul.f32.gmra.mxu0 %v931_v2  ;;  %v360_v27 = vpop.xlane.xlu0 %359  ;;  %v480_v2 = vlaneseq }
  0x96   :  { %v481_v34 = vand.u32 127, %v480_v2 }
  0x98   :  { %v483_v46 = vadd.s32 4294967288, %v481_v34  ;;  %v487_v51 = vadd.s32 4294967280, %v481_v34  ;;  %v491_v63 = vadd.s32 4294967272, %v481_v34  ;;  %v495_v42 = vadd.s32 4294967264, %v481_v34 }
  0x99   :  { %v499_v43 = vadd.s32 4294967256, %v481_v34  ;;  %v503_v15 = vadd.s32 4294967248, %v481_v34 }
  0x9b   :  { %v366_v23 = vpop.xlane.xlu1 %365  ;;  %v390_v26 = vpop.xlane.xlu2 %389 }
  0x9c   :  { %182 = vmatmul.f32.gmra.mxu0 %v976_v16 }
  0xa3   :  { %v369_v31 = vpop.xlane.xlu1 %368  ;;  %v393_v32 = vpop.xlane.xlu2 %392 }
  0xa7   :  { %v1187_v33 = vpop.permute.xlu0 %407 }
  0xa8   :  { %v410_v35 = vadd.f32 %v1187_v33, %v357_v56  ;;  %v411_v36 = vadd.f32 %v1187_v33, %v360_v27  ;;  %v418_v37 = vadd.f32 %v1187_v33, %v381_v39  ;;  %v419_v38 = vadd.f32 %v1187_v33, %v384_v57 }
  0xa9   :  { %v412_v16 = vadd.f32 %v1187_v33, %v363_v54  ;;  %v420_v45 = vadd.f32 %v1187_v33, %v387_v19  ;;  %v413_v50 = vadd.f32 %v1187_v33, %v366_v23  ;;  %v421_v53 = vadd.f32 %v1187_v33, %v390_v26 }
  0xaa   :  { %v426_v11 = vmax.f32 %v410_v35, 0.0  ;;  %v427_v47 = vmax.f32 %v411_v36, 0.0  ;;  %v434_v48 = vmax.f32 %v418_v37, 0.0  ;;  %v435_v49 = vmax.f32 %v419_v38, 0.0 }
  0xab   :  { %v372_v40 = vpop.xlane.xlu1 %371  ;;  %v396_v41 = vpop.xlane.xlu2 %395  ;;  %v428_v52 = vmax.f32 %v412_v16, 0.0  ;;  %v436_v55 = vmax.f32 %v420_v45, 0.0  ;;  %v414_v25 = vadd.f32 %v1187_v33, %v369_v31  ;;  %v429_v0 = vmax.f32 %v413_v50, 0.0 }
  0xac   :  { %v482_v59 = vperm.slane %v426_v11, %v481_v34  ;;  %v484_v60 = vperm.slane %v427_v47, %v483_v46  ;;  %v511_v61 = vperm.slane %v434_v48, %v481_v34  ;;  %v512_v62 = vperm.slane %v435_v49, %v483_v46 }
  0xad   :  { %v415_v44 = vadd.f32 %v1187_v33, %v372_v40  ;;  %v488_v1 = vperm.slane %v428_v52, %v487_v51  ;;  %v422_v4 = vadd.f32 %v1187_v33, %v393_v32  ;;  %v514_v5 = vperm.slane %v436_v55, %v487_v51 }
  0xae   :  { %v486_v13 = vsel %vm485_vm0, %v484_v60, %v482_v59  ;;  %v423_v9 = vadd.f32 %v1187_v33, %v396_v41  ;;  %v437_v58 = vmax.f32 %v421_v53, 0.0  ;;  %v513_v18 = vsel %vm485_vm0, %v512_v62, %v511_v61 }
  0xaf   :  { %v430_v8 = vmax.f32 %v414_v25, 0.0  ;;  %v490_v3 = vsel %vm489_vm1, %v488_v1, %v486_v13  ;;  %v438_v39 = vmax.f32 %v422_v4, 0.0  ;;  %v515_v54 = vsel %vm489_vm1, %v514_v5, %v513_v18  ;;  %v588_v25 = vld [vmem:[%s1378_s5 + $0x78] sm:$0xff]  ;;  %v603_v4 = vld [vmem:[%s1378_s5 + $0xf0] sm:$0xff]  ;;  %v586_v5 = vld [vmem:[%s1378_s5 + $0x68] sm:$0xff] }
  0xb0   :  { %v431_v56 = vmax.f32 %v415_v44, 0.0  ;;  %v492_v57 = vperm.slane %v429_v0, %v491_v63  ;;  %v439_v19 = vmax.f32 %v423_v9, 0.0  ;;  %v516_v14 = vperm.slane %v437_v58, %v491_v63  ;;  %v604_v0 = vld [vmem:[%s1378_s5 + $0xf8] sm:$0xff]  ;;  %v587_v44 = vld [vmem:[%s1378_s5 + $0x70] sm:$0xff]  ;;  %609 = vmatpush.msra.mxu2 %v588_v25  ;;  %v585_v9 = vld [vmem:[%s1378_s5 + $0x60] sm:$0xff] }
  0xb1   :  { %v496_v23 = vperm.slane %v430_v8, %v495_v42  ;;  %v518_v26 = vperm.slane %v438_v39, %v495_v42  ;;  %v507_v27 = vadd.s32 4294967240, %v481_v34  ;;  %629 = vmatpush.msra.mxu3 %v604_v0  ;;  %v601_v58 = vld [vmem:[%s1378_s5 + $0xe0] sm:$0xff]  ;;  %v599_v8 = vld [vmem:[%s1378_s5 + $0xd0] sm:$0xff] }
  0xb2   :  { %v494_v21 = vsel %vm493_vm2, %v492_v57, %v490_v3  ;;  %v517_v22 = vsel %vm493_vm2, %v516_v14, %v515_v54  ;;  %v500_v30 = vperm.slane %v431_v56, %v499_v43  ;;  %v520_v31 = vperm.slane %v439_v19, %v499_v43  ;;  %610 = vmatpush.msra.mxu2 %v587_v44  ;;  %v583_v43 = vld [vmem:[%s1378_s5 + $0x50] sm:$0xff]  ;;  %v582_v56 = vld [vmem:[%s1378_s5 + $0x48] sm:$0xff]  ;;  %v581_v14 = vld [vmem:[%s1378_s5 + $0x40] sm:$0xff] }
  0xb3   :  { %v375_v6 = vpop.xlane.xlu1 %374  ;;  %v399_v7 = vpop.xlane.xlu2 %398  ;;  %v498_v36 = vsel %vm497_vm3, %v496_v23, %v494_v21  ;;  %v519_v37 = vsel %vm497_vm3, %v518_v26, %v517_v22  ;;  %630 = vmatpush.msra.mxu3 %v603_v4  ;;  %v598_v57 = vld [vmem:[%s1378_s5 + $0xc8] sm:$0xff]  ;;  %v580_v21 = vld [vmem:[%s1378_s5 + $0x38] sm:$0xff]  ;;  %v575_v44 = vld [vmem:[%s1378_s5 + $0x10] sm:$0xff] }
  0xb4   :  { %v1201_v10 = vpop.f32.mrf.mxu1  ;;  %v416_v20 = vadd.f32 %v1187_v33, %v375_v6  ;;  %v424_v24 = vadd.f32 %v1187_v33, %v399_v7  ;;  %v502_v34 = vsel %vm501_vm4, %v500_v30, %v498_v36  ;;  %v521_v45 = vsel %vm501_vm4, %v520_v31, %v519_v37  ;;  %v602_v6 = vld [vmem:[%s1378_s5 + $0xe8] sm:$0xff]  ;;  %v1252_v7 = vld [vmem:[%s1380_s8] ss:$0 sm:$0xff]  ;;  %611 = vmatpush.msra.mxu2 %v586_v5  ;;  %v596_v22 = vld [vmem:[%s1378_s5 + $0xb8] sm:$0xff] }
  0xb5   :  { %631 = vmatpush.msra.mxu3 %v602_v6  ;;  %v577_v37 = vld [vmem:[%s1378_s5 + $0x20] sm:$0xff]  ;;  %v591_v4 = vld [vmem:[%s1378_s5 + $0x90] sm:$0xff]  ;;  %v574_v5 = vld [vmem:[%s1378_s5 + $0x8] sm:$0xff] }
  0xb6   :  { %v432_v17 = vmax.f32 %v416_v20, 0.0  ;;  %v440_v12 = vmax.f32 %v424_v24, 0.0  ;;  %v584_v20 = vld [vmem:[%s1378_s5 + $0x58] sm:$0xff]  ;;  %612 = vmatpush.msra.mxu2 %v585_v9  ;;  %v590_v6 = vld [vmem:[%s1378_s5 + $0x88] sm:$0xff]  ;;  %v589_v9 = vld [vmem:[%s1378_s5 + $0x80] sm:$0xff] }
  0xb7   :  { %v600_v24 = vld [vmem:[%s1378_s5 + $0xd8] sm:$0xff]  ;;  %632 = vmatpush.msra.mxu3 %v601_v58 }
  0xb8   :  { %v504_v38 = vperm.slane %v432_v17, %v503_v15  ;;  %v522_v40 = vperm.slane %v440_v12, %v503_v15  ;;  %613 = vmatpush.msra.mxu2 %v584_v20  ;;  %v597_v15 = vld [vmem:[%s1378_s5 + $0xc0] sm:$0xff] }
  0xb9   :  { %633 = vmatpush.msra.mxu3 %v600_v24 }
  0xba   :  { %v506_v47 = vsel %vm505_vm5, %v504_v38, %v502_v34  ;;  %v523_v48 = vsel %vm505_vm5, %v522_v40, %v521_v45  ;;  %614 = vmatpush.msra.mxu2 %v583_v43  ;;  %v593_v38 = vld [vmem:[%s1378_s5 + $0xa0] sm:$0xff]  ;;  %v576_v34 = vld [vmem:[%s1378_s5 + $0x18] sm:$0xff] }
  0xbb   :  { %v378_v28 = vpop.xlane.xlu1 %377  ;;  %v402_v29 = vpop.xlane.xlu2 %401  ;;  %634 = vmatpush.msra.mxu3 %v599_v8  ;;  %v592_v45 = vld [vmem:[%s1378_s5 + $0x98] sm:$0xff] }
  0xbc   :  { %v417_v32 = vadd.f32 %v1187_v33, %v378_v28  ;;  %v425_v2 = vadd.f32 %v1187_v33, %v402_v29  ;;  %v1211_v35 = vpop.f32.mrf.mxu1  ;;  %615 = vmatpush.msra.mxu2 %v582_v56  ;;  %v595_v28 = vld [vmem:[%s1378_s5 + $0xb0] sm:$0xff] }
  0xbd   :  { %635 = vmatpush.msra.mxu3 %v598_v57 }
  0xbe   :  { %v433_v16 = vmax.f32 %v417_v32, 0.0  ;;  %v441_v41 = vmax.f32 %v425_v2, 0.0  ;;  %616 = vmatpush.msra.mxu2 %v581_v14  ;;  %v578_v32 = vld [vmem:[%s1378_s5 + $0x28] sm:$0xff] }
  0xbf   :  { %v1227_v62 = vpop.f32.mrf.mxu3  ;;  %636 = vmatpush.msra.mxu3 %v597_v15  ;;  %v594_v2 = vld [vmem:[%s1378_s5 + $0xa8] sm:$0xff] }
  0xc0   :  { %v508_v46 = vperm.slane %v433_v16, %v507_v27  ;;  %v524_v11 = vperm.slane %v441_v41, %v507_v27  ;;  %v579_v27 = vld [vmem:[%s1378_s5 + $0x30] sm:$0xff]  ;;  %617 = vmatpush.msra.mxu2 %v580_v21 }
  0xc1   :  { %637 = vmatpush.msra.mxu3 %v596_v22 }
  0xc2   :  { %v510_v33 = vsel %vm509_vm6, %v508_v46, %v506_v47  ;;  %v525_v49 = vsel %vm509_vm6, %v524_v11, %v523_v48  ;;  %618 = vmatpush.msra.mxu2 %v579_v27 }
  0xc3   :  { %v527_v50 = vsel %vm526_vm7, %v525_v49, %v510_v33  ;;  %638 = vmatpush.msra.mxu3 %v595_v28 }
  0xc4   :  { %676 = vmatmul.msk.f32.vlgmr.msrb.gmra.mxu2 %vm528_vm8, %v527_v50  ;;  %677 = vmatmul.msk.f32.vlgmr.msrb.gmra.mxu3 %vm528_vm8, %v527_v50  ;;  %v1215_v51 = vpop.f32.mrf.mxu1 }
  0xc5   :  { %619 = vmatpush.msra.mxu2 %v578_v32  ;;  %639 = vmatpush.msra.mxu3 %v594_v2 }
  0xc7   :  { %v257_v13 = vpop.f32.mrf.mxu3  ;;  %620 = vmatpush.msra.mxu2 %v577_v37  ;;  %640 = vmatpush.msra.mxu3 %v593_v38 }
  0xc9   :  { %621 = vmatpush.msra.mxu2 %v576_v34  ;;  %641 = vmatpush.msra.mxu3 %v592_v45 }
  0xcb   :  { %622 = vmatpush.msra.mxu2 %v575_v44  ;;  %642 = vmatpush.msra.mxu3 %v591_v4 }
  0xcc   :  { %v1217_v52 = vpop.f32.mrf.mxu1 }
  0xcd   :  { %623 = vmatpush.msra.mxu2 %v574_v5  ;;  %643 = vmatpush.msra.mxu3 %v590_v6 }
  0xcf   :  { %v260_v19 = vpop.f32.mrf.mxu3  ;;  %644 = vmatpush.msra.mxu3 %v589_v9 }
  0xd1   :  { %v156_v58 = vpop.f32.mrf.mxu0 }
  0xd4   :  { %v1219_v53 = vpop.f32.mrf.mxu1 }
  0xd5   :  { %v1221_v55 = vpop.f32.mrf.mxu2 }
  0xd6   :  { %v187_v16 = vadd.f32 %v1252_v7, %v1221_v55 }
  0xd7   :  { %v263_v36 = vpop.f32.mrf.mxu3 }
  0xd9   :  { %v159_v24 = vpop.f32.mrf.mxu0 }
  0xdc   :  { %v1223_v59 = vpop.f32.mrf.mxu1 }
  0xdd   :  { %v189_v60 = vpop.f32.mrf.mxu2 }
  0xde   :  { %v190_v31 = vadd.f32 %v1252_v7, %v189_v60 }
  0xdf   :  { %v266_v55 = vpop.f32.mrf.mxu3 }
  0xe0   :  { %v255_v41 = vadd.f32 %v1227_v62, %v190_v31 }
  0xe1   :  { %v162_v56 = vpop.f32.mrf.mxu0 }
  0xe2   :  { %v280_v49 = vmax.f32 %v255_v41, 0.0  ;;  %v163_v57 = vadd.f32 %v1252_v7, %v162_v56 }
  0xe4   :  { %v1225_v61 = vpop.f32.mrf.mxu1  ;;  %v228_v14 = vadd.f32 %v1215_v51, %v163_v57 }
  0xe5   :  { %v192_v63 = vpop.f32.mrf.mxu2 }
  0xe6   :  { %v193_v18 = vadd.f32 %v1252_v7, %v192_v63 }
  0xe8   :  { %v258_v39 = vadd.f32 %v257_v13, %v193_v18  ;;  %v573_v13 = vld [vmem:[%s1378_s5] sm:$0xff]  ;;  %v157_v18 = vadd.f32 %v1252_v7, %v156_v58 }
  0xe9   :  { %624 = vmatpush.msra.mxu2 %v573_v13 }
  0xea   :  { %v281_v17 = vmax.f32 %v258_v39, 0.0  ;;  %v222_v20 = vadd.f32 %v1201_v10, %v157_v18 }
  0xec   :  { %v1238_v1 = vpop.f32.mrf.mxu1  ;;  %v269_v43 = vmax.f32 %v222_v20, 0.0 }
  0xed   :  { %v195_v42 = vpop.f32.mrf.mxu2 }
  0xee   :  { %v196_v54 = vadd.f32 %v1252_v7, %v195_v42  ;;  %v160_v42 = vadd.f32 %v1252_v7, %v159_v24 }
  0xf0   :  { %v261_v12 = vadd.f32 %v260_v19, %v196_v54  ;;  %v225_v8 = vadd.f32 %v1211_v35, %v160_v42  ;;  %v458_v19 = vld [vmem:[%s1377_s4] sm:$0x3]  ;;  %v271_v35 = vmax.f32 %v228_v14, 0.0  ;;  %s858_s4 = smov [#allocation9]  }
  0xf1   :  { %v460_v15 = vperm.slane %v458_v19, 0  ;;  %v461_v10 = vperm.slane %v458_v19, 1  ;;  %s658_s30 = sshll.u32 %s858_s4, 4  ;;  %s659_s30 = int_to_ptr.vmem [resolvable:$true] %s658_s30 }
  0xf2   :  { %v282_v23 = vmax.f32 %v261_v12, 0.0  ;;  %v270_v39 = vmax.f32 %v225_v8, 0.0 }
  0xf4   :  { %v1273_v3 = vpop.f32.mrf.mxu1  ;;  %v711_v30 = vpack.c.bf16 %v282_v23, %v281_v17  ;;  %v681_v54 = vpack.c.bf16 %v270_v39, %v269_v43  ;;  %v165_v17 = vpop.f32.mrf.mxu0 }
  0xf5   :  { %v198_v26 = vpop.f32.mrf.mxu2  ;;  %v166_v12 = vadd.f32 %v1252_v7, %v165_v17 }
  0xf6   :  { %723 = vst [vmem:[#allocation9 + $0x30] sm:$0xff] %v711_v30   ;;  %v199_v40 = vadd.f32 %v1252_v7, %v198_v26 }
  0xf7   :  { %682 = vst [vmem:[#allocation9] sm:$0xff] %v681_v54   ;;  %v231_v23 = vadd.f32 %v1217_v52, %v166_v12 }
  0xf8   :  { %v264_v47 = vadd.f32 %v263_v36, %v199_v40 }
  0xf9   :  { %v272_v28 = vmax.f32 %v231_v23, 0.0 }
  0xfa   :  { %v283_v60 = vmax.f32 %v264_v47, 0.0 }
  0xfb   :  { %v686_v32 = vpack.c.bf16 %v272_v28, %v271_v35 }
  0xfc   :  { %v1300_v29 = vpop.f32.mrf.mxu1  ;;  %v168_v2 = vpop.f32.mrf.mxu0 }
  0xfd   :  { %v201_v46 = vpop.f32.mrf.mxu2  ;;  %718 = vst [vmem:[#allocation9 + $0x8] sm:$0xff] %v686_v32   ;;  %v169_v51 = vadd.f32 %v1252_v7, %v168_v2 }
  0xfe   :  { %v202_v48 = vadd.f32 %v1252_v7, %v201_v46 }
  0xff   :  { %v234_v36 = vadd.f32 %v1219_v53, %v169_v51 }
 0x100   :  { %v267_v62 = vadd.f32 %v266_v55, %v202_v48 }
 0x101   :  { %v273_v40 = vmax.f32 %v234_v36, 0.0 }
 0x102   :  { %v284_v25 = vmax.f32 %v267_v62, 0.0 }
 0x104   :  { %v251_v11 = vpop.f32.mrf.mxu1  ;;  %v716_v0 = vpack.c.bf16 %v284_v25, %v283_v60  ;;  %v171_v37 = vpop.f32.mrf.mxu0 }
 0x105   :  { %v252_v33 = vadd.f32 %v251_v11, %v187_v16  ;;  %v172_v38 = vadd.f32 %v1252_v7, %v171_v37 }
 0x106   :  { %724 = vst [vmem:[#allocation9 + $0x38] sm:$0xff] %v716_v0  }
 0x107   :  { %v279_v50 = vmax.f32 %v252_v33, 0.0  ;;  %v237_v52 = vadd.f32 %v1223_v59, %v172_v38 }
 0x109   :  { %v706_v63 = vpack.c.bf16 %v280_v49, %v279_v50  ;;  %v274_v16 = vmax.f32 %v237_v52, 0.0 }
 0x10b   :  { %722 = vst [vmem:[#allocation9 + $0x28] sm:$0xff] %v706_v63   ;;  %v691_v41 = vpack.c.bf16 %v274_v16, %v273_v40 }
 0x10c   :  { %v174_v34 = vpop.f32.mrf.mxu0 }
 0x10d   :  { %719 = vst [vmem:[#allocation9 + $0x10] sm:$0xff] %v691_v41   ;;  %v175_v45 = vadd.f32 %v1252_v7, %v174_v34 }
 0x10f   :  { %v240_v46 = vadd.f32 %v1225_v61, %v175_v45 }
 0x111   :  { %v275_v48 = vmax.f32 %v240_v46, 0.0 }
 0x114   :  { %v177_v11 = vpop.f32.mrf.mxu0 }
 0x115   :  { %v178_v47 = vadd.f32 %v1252_v7, %v177_v11 }
 0x117   :  { %v243_v53 = vadd.f32 %v1238_v1, %v178_v47 }
 0x119   :  { %v276_v33 = vmax.f32 %v243_v53, 0.0 }
 0x11b   :  { %v696_v49 = vpack.c.bf16 %v276_v33, %v275_v48 }
 0x11c   :  { %v180_v50 = vpop.f32.mrf.mxu0 }
 0x11d   :  { %720 = vst [vmem:[#allocation9 + $0x18] sm:$0xff] %v696_v49   ;;  %v181_v59 = vadd.f32 %v1252_v7, %v180_v50 }
 0x11f   :  { %v246_v55 = vadd.f32 %v1273_v3, %v181_v59  ;;  %v770_v3 = vld [vmem:[#allocation3] ss:$0 sm:$0xff] }
 0x121   :  { %v277_v63 = vmax.f32 %v246_v55, 0.0 }
 0x124   :  { %v183_v60 = vpop.f32.mrf.mxu0 }
 0x125   :  { %v184_v62 = vadd.f32 %v1252_v7, %v183_v60 }
 0x127   :  { %v249_v61 = vadd.f32 %v1300_v29, %v184_v62 }
 0x129   :  { %v278_v1 = vmax.f32 %v249_v61, 0.0 }
 0x12b   :  { %v701_v25 = vpack.c.bf16 %v278_v1, %v277_v63 }
 0x12d   :  { %721 = vst [vmem:[#allocation9 + $0x20] sm:$0xff] %v701_v25  }
 0x12e   :  { %666 = dma.vmem_to_hbm [thread:$0]  %s659_s30, 1024, %s661_s13, [#allocation6], %s859_s14, %s859_s14, %s860_s15  }
 0x147   :  { %v548_v21 = vpop.f32.mrf.mxu2  ;;  %v568_v22 = vpop.f32.mrf.mxu3 }
 0x148   :  { %v549_v26 = vadd.f32 %v548_v21, %v460_v15  ;;  %v569_v27 = vadd.f32 %v568_v22, %v461_v10 }
 0x14a   :  { %v571_v30 = vmax.f32 %v549_v26, 0.0  ;;  %v572_v31 = vmax.f32 %v569_v27, 0.0 }
 0x14c   :  { %625 = vmatmul.f32.vlgmr.msra.gmra.mxu2 %v571_v30  ;;  %645 = vmatmul.f32.vlgmr.msra.gmra.mxu3 %v572_v31 }
 0x1cf   :  { %v626_v0 = vpop.f32.mrf.mxu2  ;;  %v646_v44 = vpop.f32.mrf.mxu3 }
 0x1d0   :  { %v627_v7 = vadd.f32 %v770_v3, %v626_v0 }
 0x1d2   :  { %v647_v4 = vadd.f32 %v646_v44, %v627_v7 }
 0x1d4   :  { %771 = vtanh.f32 %v647_v4 }
 0x1da   :  { %v772_v29 = vpop.eup %771 }
 0x1db   :  { %651 = vst.msk [vmem:[%s1381_s9] sm:$0x3] %vm650_vm9, %v772_v29 }
 0x1dc   :  { %849 = dma.done.wait [#allocation6], 1024  }
 0x1dd   :  { %850 = vsyncadd [#allocation6], 4294966272 }
 0x1de   :  { %673 = vsyncpa [#allocation5], 1 }
 0x1df   :  { %674 = vsyncpa [#allocation8], 1 }
 0x1e0   :  { %675 = vsyncpa [#allocation6], 1 }

</bundles_post_ra>
